<compile_context>
chip_gen: v5e
topology: v5e:2x2
jax: 0.10.0
libtpu: 0.0.40
codegen_flags: <defaults>
</compile_context>

<pallas_src>
import functools

import jax
import jax.numpy as jnp
from jax import lax
from jax.experimental import pallas as pl
from jax.experimental.pallas import tpu as pltpu


def _round_up(x, m):
    return ((x + m - 1) // m) * m


def _sepconv_kernel(x_ref, w_ref, b_ref, o_ref, *, K, C, Cout, stride, dil,
                    Wpp, Lcols, n_blk):
    """One batch-block of SepConv.

    x_ref: (n_blk, C, Lpad)      zero-padded, spatially-flattened images
    w_ref: (Cout, K*K*C)         folded depthwise*pointwise weights
    b_ref: (Cout, 1)             folded bias: bp + wp.T @ bd
    o_ref: (n_blk, Cout, Lcols)  flat output on the padded-width grid
    """
    w = w_ref[...]                                    # loaded once per grid step
    bias = b_ref[...].astype(jnp.float32)             # (Cout, 1)
    # Hoist the (small) per-tap weight slices out of the image loop.
    w_taps = [w[:, t * C:(t + 1) * C] for t in range(K * K)]

    def one_image(n, carry):
        x_img = x_ref.at[n]                           # (C, Lpad) ref view
        acc = jnp.zeros((Cout, Lcols), jnp.float32)
        for t in range(K * K):                        # K*K small: static unroll
            i, j = divmod(t, K)
            off = i * dil * Wpp + j * dil
            if stride == 1:
                rhs = x_img[:, pl.ds(off, Lcols)]     # contiguous flat window
            else:
                # TODO(synk): pre-extract the stride^2 parity-downsampled copies
                # once per image so each tap becomes an unstrided slice.
                rhs = x_img[:, pl.ds(off, Lcols, stride)]
            acc = acc + jnp.dot(w_taps[t], rhs,
                                preferred_element_type=jnp.float32)
        o_ref[n] = (acc + bias).astype(o_ref.dtype)
        return carry

    lax.fori_loop(0, n_blk, one_image, None)


def sepconv(x_nchw, wd, bd, wp, bp, *, kernel_size, stride=1, padding=0, dilation=1):
    """Pallas SepConv forward.

    x_nchw: (N, C, H, W); wd: (K, K, C) depthwise taps (PyTorch (C,1,K,K));
    bd: (C,); wp: (C, Cout) (PyTorch (Cout,C,1,1)); bp: (Cout,).
    Returns (N, Cout, Ho, Wo) matching SepConv.forward (NCHW).
    """
    N, C, H, W = x_nchw.shape
    K = kernel_size
    Cout = wp.shape[1]
    Ho = (H + 2 * padding - dilation * (K - 1) - 1) // stride + 1
    Wo = (W + 2 * padding - dilation * (K - 1) - 1) // stride + 1
    Hp, Wpp = H + 2 * padding, W + 2 * padding
    itemsize = jnp.dtype(x_nchw.dtype).itemsize

    # Flat-spatial sizes: output computed on the padded-width grid (Ho * Wpp
    # columns, the last Wpp-Wo of each row are junk and sliced off outside).
    Lcols = Ho * Wpp
    off_max = (K - 1) * dilation * (Wpp + 1)
    need = off_max + stride * (Lcols - 1) + 1          # last flat index read + 1
    Lpad = _round_up(max(Hp * Wpp, need), 128)         # lane-aligned flat length

    # --- wrapper-side pad + flatten (one cheap XLA pad pass over the input) ---
    xp = jnp.pad(x_nchw, ((0, 0), (0, 0), (padding, padding), (padding, padding)))
    xp = xp.reshape(N, C, Hp * Wpp)
    xp = jnp.pad(xp, ((0, 0), (0, 0), (0, Lpad - Hp * Wpp)))

    # --- fold depthwise into pointwise (weights only -> negligible cost) ---
    wd_flat = wd.reshape(K * K, C).astype(jnp.float32)                 # (T, C)
    w_eff = jnp.transpose(wp).astype(jnp.float32)[:, None, :] * wd_flat[None, :, :]
    w_eff = w_eff.reshape(Cout, K * K * C).astype(x_nchw.dtype)        # (Cout, T*C)
    b_eff = (bp.astype(jnp.float32)
             + bd.astype(jnp.float32) @ wp.astype(jnp.float32)).reshape(Cout, 1)

    # --- VMEM-aware batch blocking using PADDED footprints ---
    c8, co8 = _round_up(C, 8), _round_up(Cout, 8)
    Lc128 = _round_up(Lcols, 128)
    kkC128 = _round_up(K * K * C, 128)
    weight_bytes = 2 * (co8 * kkC128 * itemsize + co8 * 128 * 4)

    def blk_bytes(nb):
        in_b = nb * c8 * Lpad * itemsize
        out_b = nb * co8 * Lc128 * itemsize
        tmp_b = (co8 + c8) * Lc128 * 4                 # f32 acc + live rhs slice
        return 2 * (in_b + out_b) + tmp_b

    try:
        vmem_cap = int(getattr(pltpu.get_tpu_info(), "vmem_capacity_bytes", 64 << 20))
    except Exception:
        vmem_cap = 64 << 20                            # conservative (v7x per-TC)
    budget = min(vmem_cap // 2, 64 << 20)

    # Keep the grid length >= 2 when possible so both v7x TensorCores get work.
    max_imgs = min(8, N if N == 1 else max(1, N // 2))
    n_blk = 1
    for d in range(1, N + 1):
        if N % d == 0 and d <= max_imgs and blk_bytes(d) + weight_bytes <= budget:
            n_blk = d

    vmem_limit = int(min(max(blk_bytes(n_blk) + weight_bytes + (4 << 20), 32 << 20),
                         max(vmem_cap - (8 << 20), 32 << 20)))

    cost = pl.CostEstimate(
        flops=2 * N * Cout * C * K * K * Lcols,
        transcendentals=0,
        bytes_accessed=int(xp.size * itemsize + w_eff.size * itemsize
                           + N * Cout * Lcols * itemsize))

    kernel = functools.partial(
        _sepconv_kernel, K=K, C=C, Cout=Cout, stride=stride, dil=dilation,
        Wpp=Wpp, Lcols=Lcols, n_blk=n_blk)

    out_flat = pl.pallas_call(
        kernel,
        out_shape=jax.ShapeDtypeStruct((N, Cout, Lcols), x_nchw.dtype),
        grid_spec=pltpu.PrefetchScalarGridSpec(
            num_scalar_prefetch=0,
            grid=(N // n_blk,),
            in_specs=[
                pl.BlockSpec((n_blk, C, Lpad), lambda b: (b, 0, 0)),
                pl.BlockSpec((Cout, K * K * C), lambda b: (0, 0)),
                pl.BlockSpec((Cout, 1), lambda b: (0, 0)),
            ],
            out_specs=pl.BlockSpec((n_blk, Cout, Lcols), lambda b: (b, 0, 0)),
        ),
        compiler_params=pltpu.CompilerParams(
            dimension_semantics=("parallel",),
            vmem_limit_bytes=vmem_limit),
        cost_estimate=cost,
    )(xp, w_eff, b_eff)

    # (N, Cout, Ho, Wpp) -> drop the Wpp-Wo junk columns (cheap wrapper slice).
    return out_flat.reshape(N, Cout, Ho, Wpp)[:, :, :, :Wo]


def _reference(x_nchw, wd, bd, wp, bp, *, kernel_size, stride, padding, dilation):
    """Pure-JAX reference (lax convolutions) for correctness checking."""
    N, C, H, W = x_nchw.shape
    K = kernel_size
    Cout = wp.shape[1]
    x = jnp.transpose(x_nchw, (0, 2, 3, 1)).astype(jnp.float32)
    dw = lax.conv_general_dilated(
        x, wd.reshape(K, K, 1, C).astype(jnp.float32),
        window_strides=(stride, stride),
        padding=[(padding, padding), (padding, padding)],
        rhs_dilation=(dilation, dilation),
        dimension_numbers=('NHWC', 'HWIO', 'NHWC'),
        feature_group_count=C) + bd
    pw = lax.conv_general_dilated(
        dw, wp.reshape(1, 1, C, Cout).astype(jnp.float32),
        window_strides=(1, 1), padding='VALID',
        dimension_numbers=('NHWC', 'HWIO', 'NHWC')) + bp
    return jnp.transpose(pw, (0, 3, 1, 2))


if __name__ == "__main__":
    # SepConv(nn.Conv2d, ch_in=4, ch_out=8, kernel_size=3, stride=1, padding=1)
    N, C_IN, H, W = 2, 4, 16, 16
    C_OUT, K, STRIDE, PAD, DIL = 8, 3, 1, 1, 1

    key = jax.random.PRNGKey(0)
    k_x, k_wd, k_bd, k_wp, k_bp = jax.random.split(key, 5)

    x = jax.random.normal(k_x, (N, C_IN, H, W), jnp.float32)
    # depthwise: PyTorch weight (C_IN, 1, K, K)  -> stored here as (K, K, C_IN)
    wd = jax.random.normal(k_wd, (K, K, C_IN), jnp.float32) * 0.1
    bd = jax.random.normal(k_bd, (C_IN,), jnp.float32) * 0.1
    # pointwise: PyTorch weight (C_OUT, C_IN, 1, 1) -> stored here as (C_IN, C_OUT)
    wp = jax.random.normal(k_wp, (C_IN, C_OUT), jnp.float32) * 0.1
    bp = jax.random.normal(k_bp, (C_OUT,), jnp.float32) * 0.1

    out = sepconv(x, wd, bd, wp, bp,
                  kernel_size=K, stride=STRIDE, padding=PAD, dilation=DIL)
    out = jax.block_until_ready(out)

    ref = _reference(x, wd, bd, wp, bp,
                     kernel_size=K, stride=STRIDE, padding=PAD, dilation=DIL)
    assert out.shape == (N, C_OUT, H, W)
    assert jnp.allclose(out, ref, atol=1e-4, rtol=1e-4), \
        float(jnp.max(jnp.abs(out - ref)))

    print("KERNEL_OK")
</pallas_src>

<mosaic_0001>
module attributes {stable_mosaic.version = 11 : i64} {
  func.func @_sepconv_kernel(%arg0: i32, %arg1: memref<1x4x384xf32, #tpu.memory_space<vmem>>, %arg2: memref<8x36xf32, #tpu.memory_space<vmem>>, %arg3: memref<8x1xf32, #tpu.memory_space<vmem>>, %arg4: memref<1x8x288xf32, #tpu.memory_space<vmem>>) attributes {dimension_semantics = [#tpu.dimension_semantics<parallel>], iteration_bounds = array<i64: 2>, scalar_prefetch = 0 : i64, scratch_operands = 0 : i64, tpu.core_type = #tpu.core_type<tc>, window_params = [{transform_indices = @transform_0, window_bounds = array<i64: 1, 4, 384>}, {pipeline_mode = #tpu.pipeline_mode<synchronous>, transform_indices = @transform_1, window_bounds = array<i64: 8, 36>}, {pipeline_mode = #tpu.pipeline_mode<synchronous>, transform_indices = @transform_2, window_bounds = array<i64: 8, 1>}, {transform_indices = @transform_3, window_bounds = array<i64: 1, 8, 288>}]} {
    %c0 = arith.constant 0 : index
    %c0_0 = arith.constant 0 : index
    %0 = vector.load %arg2[%c0, %c0_0] : memref<8x36xf32, #tpu.memory_space<vmem>>, vector<8x36xf32>
    %c0_1 = arith.constant 0 : index
    %c0_2 = arith.constant 0 : index
    %1 = vector.load %arg3[%c0_1, %c0_2] : memref<8x1xf32, #tpu.memory_space<vmem>>, vector<8x1xf32>
    %2 = vector.extract_strided_slice %0 {offsets = [0, 0], sizes = [8, 4], strides = [1, 1]} : vector<8x36xf32> to vector<8x4xf32>
    %3 = vector.extract_strided_slice %0 {offsets = [0, 4], sizes = [8, 4], strides = [1, 1]} : vector<8x36xf32> to vector<8x4xf32>
    %4 = vector.extract_strided_slice %0 {offsets = [0, 8], sizes = [8, 4], strides = [1, 1]} : vector<8x36xf32> to vector<8x4xf32>
    %5 = vector.extract_strided_slice %0 {offsets = [0, 12], sizes = [8, 4], strides = [1, 1]} : vector<8x36xf32> to vector<8x4xf32>
    %6 = vector.extract_strided_slice %0 {offsets = [0, 16], sizes = [8, 4], strides = [1, 1]} : vector<8x36xf32> to vector<8x4xf32>
    %7 = vector.extract_strided_slice %0 {offsets = [0, 20], sizes = [8, 4], strides = [1, 1]} : vector<8x36xf32> to vector<8x4xf32>
    %8 = vector.extract_strided_slice %0 {offsets = [0, 24], sizes = [8, 4], strides = [1, 1]} : vector<8x36xf32> to vector<8x4xf32>
    %9 = vector.extract_strided_slice %0 {offsets = [0, 28], sizes = [8, 4], strides = [1, 1]} : vector<8x36xf32> to vector<8x4xf32>
    %10 = vector.extract_strided_slice %0 {offsets = [0, 32], sizes = [8, 4], strides = [1, 1]} : vector<8x36xf32> to vector<8x4xf32>
    %c0_i32 = arith.constant 0 : i32
    %cst = arith.constant 0.000000e+00 : f32
    %11 = vector.broadcast %cst : f32 to vector<8x288xf32>
    %c0_i32_3 = arith.constant 0 : i32
    %c0_i32_4 = arith.constant 0 : i32
    %12 = tpu.memref_slice %arg1[%c0_i32, %c0_i32_3, %c0_i32_4] : memref<1x4x384xf32, #tpu.memory_space<vmem>> -> memref<1x4x384xf32, #tpu.memory_space<vmem>>
    %13 = tpu.memref_squeeze %12 : memref<1x4x384xf32, #tpu.memory_space<vmem>> -> memref<4x384xf32, #tpu.memory_space<vmem>>
    %c0_5 = arith.constant 0 : index
    %c0_6 = arith.constant 0 : index
    %14 = vector.load %13[%c0_5, %c0_6] : memref<4x384xf32, #tpu.memory_space<vmem>>, vector<4x288xf32>
    %cst_7 = arith.constant dense<0.000000e+00> : vector<8x288xf32>
    %15 = tpu.matmul %2, %14, %cst_7 {dimension_numbers = #tpu.dot_dimension_numbers<[1], [0], [0], [1], [0, 0, 1, 1], [], []>} : vector<8x4xf32>, vector<4x288xf32>, vector<8x288xf32> -> vector<8x288xf32>
    %16 = arith.addf %11, %15 : vector<8x288xf32>
    %c0_i32_8 = arith.constant 0 : i32
    %c0_i32_9 = arith.constant 0 : i32
    %17 = tpu.memref_slice %arg1[%c0_i32, %c0_i32_8, %c0_i32_9] : memref<1x4x384xf32, #tpu.memory_space<vmem>> -> memref<1x4x384xf32, #tpu.memory_space<vmem>>
    %18 = tpu.memref_squeeze %17 : memref<1x4x384xf32, #tpu.memory_space<vmem>> -> memref<4x384xf32, #tpu.memory_space<vmem>>
    %c0_10 = arith.constant 0 : index
    %c1 = arith.constant 1 : index
    %19 = vector.load %18[%c0_10, %c1] : memref<4x384xf32, #tpu.memory_space<vmem>>, vector<4x288xf32>
    %cst_11 = arith.constant dense<0.000000e+00> : vector<8x288xf32>
    %20 = tpu.matmul %3, %19, %cst_11 {dimension_numbers = #tpu.dot_dimension_numbers<[1], [0], [0], [1], [0, 0, 1, 1], [], []>} : vector<8x4xf32>, vector<4x288xf32>, vector<8x288xf32> -> vector<8x288xf32>
    %21 = arith.addf %16, %20 : vector<8x288xf32>
    %c0_i32_12 = arith.constant 0 : i32
    %c0_i32_13 = arith.constant 0 : i32
    %22 = tpu.memref_slice %arg1[%c0_i32, %c0_i32_12, %c0_i32_13] : memref<1x4x384xf32, #tpu.memory_space<vmem>> -> memref<1x4x384xf32, #tpu.memory_space<vmem>>
    %23 = tpu.memref_squeeze %22 : memref<1x4x384xf32, #tpu.memory_space<vmem>> -> memref<4x384xf32, #tpu.memory_space<vmem>>
    %c0_14 = arith.constant 0 : index
    %c2 = arith.constant 2 : index
    %24 = vector.load %23[%c0_14, %c2] : memref<4x384xf32, #tpu.memory_space<vmem>>, vector<4x288xf32>
    %cst_15 = arith.constant dense<0.000000e+00> : vector<8x288xf32>
    %25 = tpu.matmul %4, %24, %cst_15 {dimension_numbers = #tpu.dot_dimension_numbers<[1], [0], [0], [1], [0, 0, 1, 1], [], []>} : vector<8x4xf32>, vector<4x288xf32>, vector<8x288xf32> -> vector<8x288xf32>
    %26 = arith.addf %21, %25 : vector<8x288xf32>
    %c0_i32_16 = arith.constant 0 : i32
    %c0_i32_17 = arith.constant 0 : i32
    %27 = tpu.memref_slice %arg1[%c0_i32, %c0_i32_16, %c0_i32_17] : memref<1x4x384xf32, #tpu.memory_space<vmem>> -> memref<1x4x384xf32, #tpu.memory_space<vmem>>
    %28 = tpu.memref_squeeze %27 : memref<1x4x384xf32, #tpu.memory_space<vmem>> -> memref<4x384xf32, #tpu.memory_space<vmem>>
    %c0_18 = arith.constant 0 : index
    %c18 = arith.constant 18 : index
    %29 = vector.load %28[%c0_18, %c18] : memref<4x384xf32, #tpu.memory_space<vmem>>, vector<4x288xf32>
    %cst_19 = arith.constant dense<0.000000e+00> : vector<8x288xf32>
    %30 = tpu.matmul %5, %29, %cst_19 {dimension_numbers = #tpu.dot_dimension_numbers<[1], [0], [0], [1], [0, 0, 1, 1], [], []>} : vector<8x4xf32>, vector<4x288xf32>, vector<8x288xf32> -> vector<8x288xf32>
    %31 = arith.addf %26, %30 : vector<8x288xf32>
    %c0_i32_20 = arith.constant 0 : i32
    %c0_i32_21 = arith.constant 0 : i32
    %32 = tpu.memref_slice %arg1[%c0_i32, %c0_i32_20, %c0_i32_21] : memref<1x4x384xf32, #tpu.memory_space<vmem>> -> memref<1x4x384xf32, #tpu.memory_space<vmem>>
    %33 = tpu.memref_squeeze %32 : memref<1x4x384xf32, #tpu.memory_space<vmem>> -> memref<4x384xf32, #tpu.memory_space<vmem>>
    %c0_22 = arith.constant 0 : index
    %c19 = arith.constant 19 : index
    %34 = vector.load %33[%c0_22, %c19] : memref<4x384xf32, #tpu.memory_space<vmem>>, vector<4x288xf32>
    %cst_23 = arith.constant dense<0.000000e+00> : vector<8x288xf32>
    %35 = tpu.matmul %6, %34, %cst_23 {dimension_numbers = #tpu.dot_dimension_numbers<[1], [0], [0], [1], [0, 0, 1, 1], [], []>} : vector<8x4xf32>, vector<4x288xf32>, vector<8x288xf32> -> vector<8x288xf32>
    %36 = arith.addf %31, %35 : vector<8x288xf32>
    %c0_i32_24 = arith.constant 0 : i32
    %c0_i32_25 = arith.constant 0 : i32
    %37 = tpu.memref_slice %arg1[%c0_i32, %c0_i32_24, %c0_i32_25] : memref<1x4x384xf32, #tpu.memory_space<vmem>> -> memref<1x4x384xf32, #tpu.memory_space<vmem>>
    %38 = tpu.memref_squeeze %37 : memref<1x4x384xf32, #tpu.memory_space<vmem>> -> memref<4x384xf32, #tpu.memory_space<vmem>>
    %c0_26 = arith.constant 0 : index
    %c20 = arith.constant 20 : index
    %39 = vector.load %38[%c0_26, %c20] : memref<4x384xf32, #tpu.memory_space<vmem>>, vector<4x288xf32>
    %cst_27 = arith.constant dense<0.000000e+00> : vector<8x288xf32>
    %40 = tpu.matmul %7, %39, %cst_27 {dimension_numbers = #tpu.dot_dimension_numbers<[1], [0], [0], [1], [0, 0, 1, 1], [], []>} : vector<8x4xf32>, vector<4x288xf32>, vector<8x288xf32> -> vector<8x288xf32>
    %41 = arith.addf %36, %40 : vector<8x288xf32>
    %c0_i32_28 = arith.constant 0 : i32
    %c0_i32_29 = arith.constant 0 : i32
    %42 = tpu.memref_slice %arg1[%c0_i32, %c0_i32_28, %c0_i32_29] : memref<1x4x384xf32, #tpu.memory_space<vmem>> -> memref<1x4x384xf32, #tpu.memory_space<vmem>>
    %43 = tpu.memref_squeeze %42 : memref<1x4x384xf32, #tpu.memory_space<vmem>> -> memref<4x384xf32, #tpu.memory_space<vmem>>
    %c0_30 = arith.constant 0 : index
    %c36 = arith.constant 36 : index
    %44 = vector.load %43[%c0_30, %c36] : memref<4x384xf32, #tpu.memory_space<vmem>>, vector<4x288xf32>
    %cst_31 = arith.constant dense<0.000000e+00> : vector<8x288xf32>
    %45 = tpu.matmul %8, %44, %cst_31 {dimension_numbers = #tpu.dot_dimension_numbers<[1], [0], [0], [1], [0, 0, 1, 1], [], []>} : vector<8x4xf32>, vector<4x288xf32>, vector<8x288xf32> -> vector<8x288xf32>
    %46 = arith.addf %41, %45 : vector<8x288xf32>
    %c0_i32_32 = arith.constant 0 : i32
    %c0_i32_33 = arith.constant 0 : i32
    %47 = tpu.memref_slice %arg1[%c0_i32, %c0_i32_32, %c0_i32_33] : memref<1x4x384xf32, #tpu.memory_space<vmem>> -> memref<1x4x384xf32, #tpu.memory_space<vmem>>
    %48 = tpu.memref_squeeze %47 : memref<1x4x384xf32, #tpu.memory_space<vmem>> -> memref<4x384xf32, #tpu.memory_space<vmem>>
    %c0_34 = arith.constant 0 : index
    %c37 = arith.constant 37 : index
    %49 = vector.load %48[%c0_34, %c37] : memref<4x384xf32, #tpu.memory_space<vmem>>, vector<4x288xf32>
    %cst_35 = arith.constant dense<0.000000e+00> : vector<8x288xf32>
    %50 = tpu.matmul %9, %49, %cst_35 {dimension_numbers = #tpu.dot_dimension_numbers<[1], [0], [0], [1], [0, 0, 1, 1], [], []>} : vector<8x4xf32>, vector<4x288xf32>, vector<8x288xf32> -> vector<8x288xf32>
    %51 = arith.addf %46, %50 : vector<8x288xf32>
    %c0_i32_36 = arith.constant 0 : i32
    %c0_i32_37 = arith.constant 0 : i32
    %52 = tpu.memref_slice %arg1[%c0_i32, %c0_i32_36, %c0_i32_37] : memref<1x4x384xf32, #tpu.memory_space<vmem>> -> memref<1x4x384xf32, #tpu.memory_space<vmem>>
    %53 = tpu.memref_squeeze %52 : memref<1x4x384xf32, #tpu.memory_space<vmem>> -> memref<4x384xf32, #tpu.memory_space<vmem>>
    %c0_38 = arith.constant 0 : index
    %c38 = arith.constant 38 : index
    %54 = vector.load %53[%c0_38, %c38] : memref<4x384xf32, #tpu.memory_space<vmem>>, vector<4x288xf32>
    %cst_39 = arith.constant dense<0.000000e+00> : vector<8x288xf32>
    %55 = tpu.matmul %10, %54, %cst_39 {dimension_numbers = #tpu.dot_dimension_numbers<[1], [0], [0], [1], [0, 0, 1, 1], [], []>} : vector<8x4xf32>, vector<4x288xf32>, vector<8x288xf32> -> vector<8x288xf32>
    %56 = arith.addf %51, %55 : vector<8x288xf32>
    %57 = vector.broadcast %1 : vector<8x1xf32> to vector<8x288xf32>
    %58 = arith.addf %56, %57 : vector<8x288xf32>
    %59 = arith.index_cast %c0_i32 : i32 to index
    %c0_40 = arith.constant 0 : index
    %c0_41 = arith.constant 0 : index
    %60 = vector.load %arg4[%59, %c0_40, %c0_41] : memref<1x8x288xf32, #tpu.memory_space<vmem>>, vector<1x8x288xf32>
    %61 = vector.shape_cast %60 : vector<1x8x288xf32> to vector<8x288xf32>
    %62 = vector.shape_cast %58 : vector<8x288xf32> to vector<1x8x288xf32>
    tpu.vector_store %arg4[%59, %c0_40, %c0_41], %62 {strides = array<i32>} : memref<1x8x288xf32, #tpu.memory_space<vmem>>, vector<1x8x288xf32>,
    %c1_i32 = arith.constant 1 : i32
    return
  }
  func.func @transform_0(%arg0: i32) -> (i32, i32, i32) {
    %c0_i32 = arith.constant 0 : i32
    %c0_i32_0 = arith.constant 0 : i32
    %c0_i32_1 = arith.constant 0 : i32
    return %arg0, %c0_i32, %c0_i32_0 : i32, i32, i32
  }
  func.func @transform_1(%arg0: i32) -> (i32, i32) {
    %c0_i32 = arith.constant 0 : i32
    %c0_i32_0 = arith.constant 0 : i32
    %c0_i32_1 = arith.constant 0 : i32
    return %c0_i32, %c0_i32_0 : i32, i32
  }
  func.func @transform_2(%arg0: i32) -> (i32, i32) {
    %c0_i32 = arith.constant 0 : i32
    %c0_i32_0 = arith.constant 0 : i32
    %c0_i32_1 = arith.constant 0 : i32
    return %c0_i32, %c0_i32_0 : i32, i32
  }
  func.func @transform_3(%arg0: i32) -> (i32, i32, i32) {
    %c0_i32 = arith.constant 0 : i32
    %c0_i32_0 = arith.constant 0 : i32
    %c0_i32_1 = arith.constant 0 : i32
    return %arg0, %c0_i32, %c0_i32_0 : i32, i32, i32
  }
}

</mosaic_0001>

<bundles_post_ra>
// kernel: tpu_custom_call.1
= control target key start
LH: loop header
LB: loop body
LE: loop exit
PB: predicated region body
PF: predicated region fallthrough
CT: control target
= control target key end

     0   :  { %8 = vsyncpa [#allocation3], 0  ;;  %s1597_s0 = inlined_call_operand.hbm [shape: f32[2,4,384], index: 0, kind: input, shape index: {}]   ;;  %s1598_s1 = inlined_call_operand.vmem [shape: f32[8,36], index: 1, kind: input, shape index: {}]   ;;  %s1599_s2 = inlined_call_operand.vmem [shape: f32[8,1], index: 2, kind: input, shape index: {}]   ;;  %s1600_s3 = inlined_call_operand.hbm [shape: f32[2,8,288], index: 3, kind: output, shape index: {}]  }
   0x1   :  { %10 = vsyncpa [#allocation3 + $0x1], 0 }
   0x2   :  { %11 = vsyncpa [#allocation4], 0 }
   0x3   :  { %13 = vsyncpa [#allocation4 + $0x1], 0  ;;  %s1365_s12 = smov 0   ;;  %s1367_s13 = smov 0  }
   0x4   :  { %s1369_s14 = smov 0   ;;  %s1371_s15 = smov 0  }
   0x5 LB: > { %s1386_s16 = sadd.s32 4294967295, %s1327_s15   ;;  %s1100_s17 = sadd.s32 4294967294, %s1327_s15   ;;  %s1327_s15 = sphi %s1371_s15, %s1608_s15   ;;  %s1323_s14 = sphi %s1369_s14, %s1607_s14   ;;  %s1319_s13 = sphi %s1367_s13, %s1606_s13   ;;  %s1315_s12 = sphi %s1365_s12, %s1605_s12  }
   0x6   : > { %s1390_s18 = sadd.s32 1, %s1327_s15   ;;  %s26_s19 = sadd.s32 1, %s1323_s14 }
   0x7   : > { %s23_s20 = ssub.s32 %s1327_s15, %s1390_s18  ;;  %p33_p0 = scmp.ne.s32.totalorder %s1323_s14, %s1319_s13 }
   0x8   : > { %p24_p1 = scmp.eq.s32.totalorder %s23_s20, 0  ;;  %p34_p2 = scmp.eq.s32.totalorder %s1327_s15, 0 }
   0x9   : > { %p39_p3 = scmp.ne.s32.totalorder %s1319_s13, %s1315_s12  ;;  %p40_p4 = scmp.eq.s32.totalorder %s1386_s16, 0 }
   0xa   : > { %s1402_s21 = scalar_select %p24_p1, %s1323_s14, %s26_s19  }
   0xb   : > { %p35_p5 = por %p34_p2, %p33_p0  ;;  %p1404_p6 = por %p40_p4, %p39_p3 }
   0xc   : > { %p105_p7 = scmp.eq.s32.totalorder %s1386_s16, 1  ;;  %p111_p8 = scmp.eq.s32.totalorder %s1100_s17, 1 }
   0xd   : > { %p1102_p9 = scmp.ge.s32.totalorder %s1327_s15, 2  ;;  %p1179_p10 = scmp.lt.s32.totalorder %s1327_s15, 2 }
   0xe   : > { %p1411_p11 = por %p105_p7, %p33_p0  ;;  %p1415_p12 = por %p111_p8, %p39_p3 }
   0xf   : > { %s137_s25 = sand.u32 1, %s1323_s14   ;;  %s1163_s26 = smul.u32 12, %s1327_s15 }
  0x10   : > { %s1162_s27 = smul.u32 12, %s137_s25  ;;  %p1424_p13 = pnand %p1179_p10, %p35_p5 }
  0x11   : > { %s146_s30 = scalar_lea.hbm %s1597_s0, %s1163_s26  ;;  %s138_s8 = scalar_lea.sflag [#allocation3], %s137_s25 }
  0x12   : > { %s148_s5 = sshll.u32 %s146_s30, 4  ;;  %s141_s6 = scalar_lea.vmem [#allocation2], %s1162_s27  ;;  %s149_s5 = int_to_ptr.hbm [resolvable:$true] %s148_s5 }
  0x13   : > { %s150_s7 = sshll.u32 %s141_s6, 4  ;;  %s1231_s9 = sshra.s32 %s149_s5, 4  ;;  %s151_s7 = int_to_ptr.vmem [resolvable:$true] %s150_s7  ;;  %s1232_s9 = int_to_ptr.hbm [resolvable:$true] %s1231_s9 }
  0x14   : > { %s1233_s10 = scalar_lea.hbm %s1232_s9, 12  ;;  %p1235_p1 = pneg %p1424_p13 }
  0x15   : > { %p1234_p0 = scmp.ne.s32.totalorder %s1232_s9, %s1233_s10  ;;  %s1238_s19 = scalar_lea.hbm %s1597_s0, 24 }
  0x16   : > { %p1239_p4 = scmp.lt.s32.totalorder %s1232_s9, %s1597_s0  ;;  %p1240_p5 = scmp.lt.s32.totalorder %s1238_s19, %s1233_s10 }
  0x17   : > { %p1236_p2 = pnand %p1235_p1, %p1234_p0 }
  0x18   : > { %p1241_p7 = por %p1240_p5, %p1239_p4 }
  0x19   : > { %p1237_p3 = pneg %p1236_p2 }
  0x1b   : > { %p1242_p8 = pnand %p1241_p7, %p1237_p3 }
  0x1d   : > { %1245 = shalt.err (!%p1242_p8)
}
  0x1e   : > { %1174 = dma.hbm_to_vmem [thread:$0]  (!%p1424_p13), %s149_s5, 192, %s151_s7, %s138_s8  }
  0x1f   : > { %p1104_p10 = scmp.ge.s32.totalorder %s1327_s15, 1  ;;  %p155_p0 = scmp.lt.s32.totalorder %s1327_s15, 3 }
  0x21   : > { %p156_p1 = pnand %p1104_p10, %p155_p0 }
  0x22   : > { %s1441_s25 = sand.u32 (!%p156_p1), 1, %s1319_s13  }
  0x23   : > { %159 = sbr.rel (%p156_p1) target bundleno = 381 (0x17d), region = 32  ;;  %s162_s28 = scalar_lea.sflag (!%p156_p1), [#allocation3], %s1441_s25 }
  0x24   : > { %s1164_s27 = smul.u32 (!%p156_p1), 12, %s1441_s25 }
  0x26   : > { %s1445_s29 = scalar_lea.vmem (!%p156_p1), [#allocation2], %s1164_s27 }
  0x28   : > { %1306 = dma.done.wait (%p1404_p6), %s162_s28, 192  }
  0x29   : > { %1308 = vsyncadd (%p1404_p6), %s162_s28, 4294967104  ;;  %v1454_v0 = vld [vmem:[%s1598_s1] sm:$0xff]  ;;  %v1457_v1 = vld [vmem:[%s1445_s29] sm:$0xff]  ;;  %s1329_s5 = smov 116   ;;  %s1330_s6 = smov 124   ;;  %vm216_vm0 = vcmask 1043456  }
  0x2a   : > { %v192_v2 = vld [vmem:[%s1445_s29 + $0x8] sm:$0xf]  ;;  %451 = vrot.lane.b32.xlu1 %v1454_v0, %s1329_s5  ;;  %194 = vrot.lane.b32.xlu0 %v1454_v0, %s1330_s6  ;;  %198 = vst [vmem:[#allocation1] ss:$2 sm:$0xff] %v1457_v1  ;;  %s1331_s22 = smov 127   ;;  %s1332_s7 = smov 120  }
  0x2b   : > { %200 = vst [vmem:[#allocation1 + $0x10] ss:$2 sm:$0xff] %v192_v2  ;;  %v358_v6 = vld [vmem:[%s1445_s29 + $0x8] sm:$0xf]  ;;  %s1333_s8 = smov 126   ;;  %s1334_s9 = smov 112  }
  0x2c   : > { %v450_v10 = vld [vmem:[%s1445_s29 + $0x8] sm:$0xf]  ;;  %s1335_s10 = smov 108   ;;  %s1336_s11 = smov 110   ;;  %vm213_vm1 = vcmask 31744   ;;  %vm210_vm2 = vcmask 1039360  }
  0x2d   : > { %v542_v14 = vld [vmem:[%s1445_s29 + $0x8] sm:$0xf]  ;;  %s1337_s17 = smov 109   ;;  %s1338_s19 = smov 104   ;;  %vm375_vm3 = vcmask 1031168   ;;  %vm467_vm4 = vcmask 900096  }
  0x2e   : > { %v634_v18 = vld [vmem:[%s1445_s29 + $0x8] sm:$0xf]  ;;  %s1339_s20 = smov 92   ;;  %s1340_s26 = smov 91   ;;  %vm651_vm5 = vcmask 883712   ;;  %vm559_vm6 = vcmask 891904  }
  0x2f   : > { %v726_v22 = vld [vmem:[%s1445_s29 + $0x8] sm:$0xf]  ;;  %s1341_s27 = smov 90   ;;  %s1342_s28 = smov 100   ;;  %vm743_vm7 = vcmask 752640   ;;  %vm835_vm8 = vcmask 744448  }
  0x30   : > { %v818_v26 = vld [vmem:[%s1445_s29 + $0x8] sm:$0xf]  ;;  %vm927_vm9 = vcmask 736256   ;;  %s1165_s5 = smul.u32 24, %s1441_s25  ;;  %vm1011_vm10 = vcmask 261120  }
  0x31   : > { %v201_v3 = vld.sshfl [vmem:[#allocation1] sm:$0xff pattern:$0x75316420]  ;;  %v202_v4 = vld.sshfl [vmem:[#allocation1 + $0x8] sm:$0xff pattern:$0x75316420] }
  0x32   : > { %204 = vrot.lane.b32.xlu1 %v201_v3, %s1331_s22  ;;  %359 = vrot.lane.b32.xlu0 %v1454_v0, %s1332_s7  ;;  %283 = vst [vmem:[#allocation1] ss:$2 sm:$0xff] %v1457_v1  ;;  %v203_v5 = vld.sshfl [vmem:[#allocation1 + $0x10] sm:$0xff pattern:$0x75316420]  ;;  %s1166_s6 = smul.u32 24, %s1386_s16 }
  0x33   : > { %285 = vst [vmem:[#allocation1 + $0x10] ss:$2 sm:$0xff] %v192_v2  ;;  %v910_v30 = vld [vmem:[%s1445_s29 + $0x8] sm:$0xf]  ;;  %s1343_s29 = smov 96   ;;  %s188_s16 = scalar_lea.vmem [#allocation5], %s1165_s5 }
  0x39   : > { %v1466_v7 = vld.sshfl [vmem:[#allocation1] sm:$0xff pattern:$0x75316420]  ;;  %v1468_v8 = vld.sshfl [vmem:[#allocation1 + $0x8] sm:$0xff pattern:$0x75316420] }
  0x3a   : > { %363 = vst [vmem:[#allocation1] ss:$2 sm:$0xff] %v1457_v1  ;;  %206 = vrot.lane.b32.xlu1 %v202_v4, %s1331_s22  ;;  %208 = vrot.lane.b32.xlu0 %v203_v5, %s1331_s22  ;;  %v1471_v9 = vld.sshfl [vmem:[#allocation1 + $0x10] sm:$0xff pattern:$0x75316420] }
  0x3b   : > { %365 = vst [vmem:[#allocation1 + $0x10] ss:$2 sm:$0xff] %v358_v6  ;;  %1111 = vmatpush.msk.msra.mxu3 %vm216_vm0, %v1466_v7  ;;  %v190_v7 = vld [vmem:[%s1599_s2] sm:$0xff] }
  0x3c   : > { %1112 = vmatmul.msk.f32.vlgmr.msra.gmra.mxu3 %vm213_vm1, %v1454_v0 }
  0x41   : > { %v366_v11 = vld.sshfl [vmem:[#allocation1] sm:$0xff pattern:$0x75316420]  ;;  %v367_v12 = vld.sshfl [vmem:[#allocation1 + $0x8] sm:$0xff pattern:$0x75316420] }
  0x42   : > { %369 = vrot.lane.b32.xlu2 %v366_v11, %s1333_s8  ;;  %543 = vrot.lane.b32.xlu1 %v1454_v0, %s1334_s9  ;;  %455 = vst [vmem:[#allocation1] ss:$2 sm:$0xff] %v1457_v1  ;;  %v368_v13 = vld.sshfl [vmem:[#allocation1 + $0x10] sm:$0xff pattern:$0x75316420]  ;;  %s1027_s9 = sshll.u32 %s188_s16, 4  ;;  %s1028_s9 = int_to_ptr.vmem [resolvable:$true] %s1027_s9 }
  0x43   : > { %635 = vrot.lane.b32.xlu0 %v1454_v0, %s1335_s10  ;;  %457 = vst [vmem:[#allocation1 + $0x10] ss:$2 sm:$0xff] %v450_v10 }
  0x49   : > { %v459_v15 = vld.sshfl [vmem:[#allocation1 + $0x8] sm:$0xff pattern:$0x75316420]  ;;  %v458_v16 = vld.sshfl [vmem:[#allocation1] sm:$0xff pattern:$0x75316420] }
  0x4a   : > { %371 = vrot.lane.b32.xlu2 %v367_v12, %s1333_s8  ;;  %373 = vrot.lane.b32.xlu1 %v368_v13, %s1333_s8  ;;  %v460_v17 = vld.sshfl [vmem:[#allocation1 + $0x10] sm:$0xff pattern:$0x75316420]  ;;  %547 = vst [vmem:[#allocation1] ss:$2 sm:$0xff] %v1457_v1  ;;  %s1025_s8 = scalar_lea.hbm %s1600_s3, %s1166_s6 }
  0x4b   : > { %549 = vst [vmem:[#allocation1 + $0x10] ss:$2 sm:$0xff] %v542_v14  ;;  %465 = vrot.lane.b32.xlu0 %v460_v17, %s1336_s11 }
  0x51   : > { %v550_v19 = vld.sshfl [vmem:[#allocation1] sm:$0xff pattern:$0x75316420]  ;;  %v551_v20 = vld.sshfl [vmem:[#allocation1 + $0x8] sm:$0xff pattern:$0x75316420] }
  0x52   : > { %463 = vrot.lane.b32.xlu2 %v459_v15, %s1336_s11  ;;  %v552_v21 = vld.sshfl [vmem:[#allocation1 + $0x10] sm:$0xff pattern:$0x75316420]  ;;  %639 = vst [vmem:[#allocation1] ss:$2 sm:$0xff] %v1457_v1 }
  0x53   : > { %641 = vst [vmem:[#allocation1 + $0x10] ss:$2 sm:$0xff] %v634_v18  ;;  %557 = vrot.lane.b32.xlu0 %v552_v21, %s1337_s17 }
  0x59   : > { %v642_v23 = vld.sshfl [vmem:[#allocation1] sm:$0xff pattern:$0x75316420]  ;;  %v643_v24 = vld.sshfl [vmem:[#allocation1 + $0x8] sm:$0xff pattern:$0x75316420] }
  0x5a   : > { %461 = vrot.lane.b32.xlu2 %v458_v16, %s1336_s11  ;;  %645 = vrot.lane.b32.xlu1 %v642_v23, %s1335_s10  ;;  %v644_v25 = vld.sshfl [vmem:[#allocation1 + $0x10] sm:$0xff pattern:$0x75316420]  ;;  %731 = vst [vmem:[#allocation1] ss:$2 sm:$0xff] %v1457_v1  ;;  %s1014_s11 = scalar_lea.sflag [#allocation4], %s1441_s25 }
  0x5b   : > { %555 = vrot.lane.b32.xlu0 %v551_v20, %s1337_s17  ;;  %733 = vst [vmem:[#allocation1 + $0x10] ss:$2 sm:$0xff] %v726_v22 }
  0x61   : > { %v735_v27 = vld.sshfl [vmem:[#allocation1 + $0x8] sm:$0xff pattern:$0x75316420]  ;;  %v734_v28 = vld.sshfl [vmem:[#allocation1] sm:$0xff pattern:$0x75316420] }
  0x62   : > { %553 = vrot.lane.b32.xlu2 %v550_v19, %s1337_s17  ;;  %v736_v29 = vld.sshfl [vmem:[#allocation1 + $0x10] sm:$0xff pattern:$0x75316420]  ;;  %649 = vrot.lane.b32.xlu1 %v644_v25, %s1335_s10  ;;  %823 = vst [vmem:[#allocation1] ss:$2 sm:$0xff] %v1457_v1 }
  0x63   : > { %825 = vst [vmem:[#allocation1 + $0x10] ss:$2 sm:$0xff] %v818_v26  ;;  %727 = vrot.lane.b32.xlu0 %v1454_v0, %s1338_s19 }
  0x69   : > { %v827_v31 = vld.sshfl [vmem:[#allocation1 + $0x8] sm:$0xff pattern:$0x75316420]  ;;  %v826_v32 = vld.sshfl [vmem:[#allocation1] sm:$0xff pattern:$0x75316420] }
  0x6a   : > { %647 = vrot.lane.b32.xlu2 %v643_v24, %s1335_s10  ;;  %737 = vrot.lane.b32.xlu1 %v734_v28, %s1339_s20  ;;  %v828_v33 = vld.sshfl [vmem:[#allocation1 + $0x10] sm:$0xff pattern:$0x75316420]  ;;  %915 = vst [vmem:[#allocation1] ss:$2 sm:$0xff] %v1457_v1  ;;  %s1029_s10 = sshll.u32 %s1025_s8, 4  ;;  %s1030_s10 = int_to_ptr.hbm [resolvable:$true] %s1029_s10 }
  0x6b   : > { %831 = vrot.lane.b32.xlu0 %v827_v31, %s1340_s26  ;;  %917 = vst [vmem:[#allocation1 + $0x10] ss:$2 sm:$0xff] %v910_v30  ;;  %s1275_s17 = sshra.s32 %s1030_s10, 4  ;;  %s1276_s17 = int_to_ptr.hbm [resolvable:$true] %s1275_s17 }
  0x6c   : > { %s1277_s19 = scalar_lea.hbm %s1276_s17, 24  ;;  %p1282_p3 = scmp.lt.s32.totalorder %s1276_s17, %s1600_s3 }
  0x6d   : > { %p1278_p6 = scmp.ne.s32.totalorder %s1276_s17, %s1277_s19 }
  0x6f   : > { %p1279_p13 = pnand %p1278_p6, %p1411_p11 }
  0x71   : > { %v918_v35 = vld.sshfl [vmem:[#allocation1] sm:$0xff pattern:$0x75316420]  ;;  %v919_v36 = vld.sshfl [vmem:[#allocation1 + $0x8] sm:$0xff pattern:$0x75316420]  ;;  %p1280_p2 = pneg %p1279_p13 }
  0x72   : > { %739 = vrot.lane.b32.xlu2 %v735_v27, %s1339_s20  ;;  %833 = vrot.lane.b32.xlu1 %v828_v33, %s1340_s26  ;;  %v920_v34 = vld.sshfl [vmem:[#allocation1 + $0x10] sm:$0xff pattern:$0x75316420] }
  0x73   : > { %829 = vrot.lane.b32.xlu0 %v826_v32, %s1340_s26 }
  0x7a   : > { %741 = vrot.lane.b32.xlu2 %v736_v29, %s1339_s20  ;;  %925 = vrot.lane.b32.xlu1 %v920_v34, %s1341_s27 }
  0x7b   : > { %921 = vrot.lane.b32.xlu0 %v918_v35, %s1341_s27 }
  0x82   : > { %923 = vrot.lane.b32.xlu1 %v919_v36, %s1341_s27  ;;  %819 = vrot.lane.b32.xlu2 %v1454_v0, %s1342_s28  ;;  %s1281_s27 = scalar_lea.hbm %s1600_s3, 48 }
  0x83   : > { %p1283_p4 = scmp.lt.s32.totalorder %s1281_s27, %s1277_s19 }
  0x85   : > { %p1284_p5 = por %p1283_p4, %p1282_p3 }
  0x87   : > { %p1285_p7 = pnand %p1284_p5, %p1280_p2 }
  0x8a   : > { %911 = vrot.lane.b32.xlu2 %v1454_v0, %s1343_s29 }
  0x9c   : > { %v370_v37 = vpop.permute.xlu2 %369  ;;  %v452_v38 = vpop.permute.xlu1 %451 }
  0x9d   : > { %v195_v39 = vpop.permute.xlu0 %194 }
  0xa4   : > { %v372_v40 = vpop.permute.xlu2 %371  ;;  %v205_v41 = vpop.permute.xlu1 %204 }
  0xa5   : > { %v360_v42 = vpop.permute.xlu0 %359  ;;  %v376_v48 = vsel %vm375_vm3, %v370_v37, %v372_v40 }
  0xac   : > { %v464_v43 = vpop.permute.xlu2 %463  ;;  %v207_v44 = vpop.permute.xlu1 %206 }
  0xad   : > { %v209_v45 = vpop.permute.xlu0 %208  ;;  %v211_v46 = vsel %vm210_vm2, %v205_v41, %v207_v44 }
  0xae   : > { %1109 = vmatpush.msk.msra.mxu2 %vm216_vm0, %v209_v45  ;;  %1105 = vmatpush.msk.msra.mxu0 %vm216_vm0, %v211_v46  ;;  %v212_v47 = vsel %vm210_vm2, %v207_v44, %v209_v45 }
  0xaf   : > { %1107 = vmatpush.msk.msra.mxu1 %vm216_vm0, %v212_v47  ;;  %1110 = vmatmul.msk.f32.vlgmr.msra.gmra.mxu2 %vm213_vm1, %v195_v39 }
  0xb0   : > { %1117 = vmatpush.msk.msrb.mxu2 %vm216_vm0, %v376_v48  ;;  %1106 = vmatmul.msk.f32.vlgmr.msra.gmra.mxu0 %vm213_vm1, %v195_v39 }
  0xb1   : > { %1108 = vmatmul.msk.f32.vlgmr.msra.gmra.mxu1 %vm213_vm1, %v195_v39  ;;  %1113 = vmatpush.msk.msrb.mxu0 %vm216_vm0, %v1468_v8  ;;  %v1344_v8 = vmov 0  }
  0xb2   : > { %1115 = vmatpush.msk.msrb.mxu1 %vm216_vm0, %v1471_v9  ;;  %1229 = vset.pattern.permute.xlu2 %v1344_v8 }
  0xb3   : > { %1003 = vperm.xlu2 %1229, %v190_v7   ;;  %1230 = vset.pattern.permute.xlu0 %v1344_v8 }
  0xb4   : > { %v462_v49 = vpop.permute.xlu2 %461  ;;  %v544_v50 = vpop.permute.xlu1 %543 }
  0xb5   : > { %v468_v51 = vsel %vm467_vm4, %v462_v49, %v464_v43  ;;  %v636_v52 = vpop.permute.xlu0 %635 }
  0xb6   : > { %1123 = vmatpush.msk.msra.mxu1 %vm216_vm0, %v468_v51 }
  0xb7   : > { %1118 = vmatmul.msk.f32.vlgmr.msrb.gmra.mxu2 %vm213_vm1, %v360_v42 }
  0xb8   : > { %1114 = vmatmul.msk.f32.vlgmr.msrb.gmra.mxu0 %vm213_vm1, %v1454_v0 }
  0xb9   : > { %1116 = vmatmul.msk.f32.vlgmr.msrb.gmra.mxu1 %vm213_vm1, %v1454_v0 }
  0xbc   : > { %v554_v53 = vpop.permute.xlu2 %553  ;;  %v374_v54 = vpop.permute.xlu1 %373 }
  0xbd   : > { %v466_v55 = vpop.permute.xlu0 %465  ;;  %v377_v56 = vsel %vm375_vm3, %v372_v40, %v374_v54  ;;  %1121 = vmatpush.msk.msra.mxu0 %vm216_vm0, %v374_v54 }
  0xbe   : > { %v469_v57 = vsel %vm467_vm4, %v464_v43, %v466_v55  ;;  %1119 = vmatpush.msk.msrb.mxu3 %vm216_vm0, %v377_v56 }
  0xbf   : > { %1125 = vmatpush.msk.msra.mxu2 %vm216_vm0, %v469_v57  ;;  %1120 = vmatmul.msk.f32.vlgmr.msrb.gmra.mxu3 %vm213_vm1, %v360_v42  ;;  %v314_v26 = vpop.f32.mrf.mxu3 }
  0xc0   : > { %1122 = vmatmul.msk.f32.vlgmr.msra.gmra.mxu0 %vm213_vm1, %v360_v42  ;;  %1126 = vmatmul.msk.f32.vlgmr.msra.gmra.mxu2 %vm213_vm1, %v452_v38 }
  0xc1   : > { %1124 = vmatmul.msk.f32.vlgmr.msra.gmra.mxu1 %vm213_vm1, %v452_v38  ;;  %1127 = vmatpush.msk.msra.mxu3 %vm216_vm0, %v466_v55 }
  0xc4   : > { %v648_v58 = vpop.permute.xlu2 %647 }
  0xc5   : > { %v558_v59 = vpop.permute.xlu0 %557 }
  0xc6   : > { %1133 = vmatpush.msk.msrb.mxu2 %vm216_vm0, %v558_v59 }
  0xc7   : > { %1128 = vmatmul.msk.f32.vlgmr.msra.gmra.mxu3 %vm213_vm1, %v452_v38 }
  0xc8   : > { %1134 = vmatmul.msk.f32.vlgmr.msrb.gmra.mxu2 %vm213_vm1, %v544_v50 }
  0xcc   : > { %v740_v60 = vpop.permute.xlu2 %739  ;;  %v646_v61 = vpop.permute.xlu1 %645 }
  0xcd   : > { %v652_v62 = vsel %vm651_vm5, %v646_v61, %v648_v58  ;;  %v556_v63 = vpop.permute.xlu0 %555 }
  0xce   : > { %v560_v0 = vsel %vm559_vm6, %v554_v53, %v556_v63  ;;  %v561_v1 = vsel %vm559_vm6, %v556_v63, %v558_v59  ;;  %1135 = vmatpush.msk.msrb.mxu3 %vm216_vm0, %v652_v62 }
  0xcf   : > { %1129 = vmatpush.msk.msrb.mxu0 %vm216_vm0, %v560_v0  ;;  %1131 = vmatpush.msk.msrb.mxu1 %vm216_vm0, %v561_v1 }
  0xd0   : > { %1130 = vmatmul.msk.f32.vlgmr.msrb.gmra.mxu0 %vm213_vm1, %v544_v50  ;;  %1132 = vmatmul.msk.f32.vlgmr.msrb.gmra.mxu1 %vm213_vm1, %v544_v50 }
  0xd1   : > { %1136 = vmatmul.msk.f32.vlgmr.msrb.gmra.mxu3 %vm213_vm1, %v636_v52 }
  0xd4   : > { %v742_v2 = vpop.permute.xlu2 %741  ;;  %v650_v3 = vpop.permute.xlu1 %649 }
  0xd5   : > { %v745_v4 = vsel %vm743_vm7, %v740_v60, %v742_v2  ;;  %v653_v5 = vsel %vm651_vm5, %v648_v58, %v650_v3  ;;  %v728_v6 = vpop.permute.xlu0 %727  ;;  %1139 = vmatpush.msk.msra.mxu1 %vm216_vm0, %v650_v3 }
  0xd6   : > { %1137 = vmatpush.msk.msra.mxu0 %vm216_vm0, %v653_v5  ;;  %1143 = vmatpush.msk.msra.mxu3 %vm216_vm0, %v745_v4 }
  0xd8   : > { %1145 = vmatpush.msk.msrb.mxu0 %vm216_vm0, %v742_v2  ;;  %1140 = vmatmul.msk.f32.vlgmr.msra.gmra.mxu1 %vm213_vm1, %v636_v52 }
  0xd9   : > { %1138 = vmatmul.msk.f32.vlgmr.msra.gmra.mxu0 %vm213_vm1, %v636_v52  ;;  %1144 = vmatmul.msk.f32.vlgmr.msra.gmra.mxu3 %vm213_vm1, %v728_v6 }
  0xdc   : > { %v738_v9 = vpop.permute.xlu1 %737  ;;  %v820_v12 = vpop.permute.xlu2 %819 }
  0xdd   : > { %v744_v10 = vsel %vm743_vm7, %v738_v9, %v740_v60  ;;  %v832_v11 = vpop.permute.xlu0 %831 }
  0xde   : > { %1141 = vmatpush.msk.msra.mxu2 %vm216_vm0, %v744_v10 }
  0xdf   : > { %1142 = vmatmul.msk.f32.vlgmr.msra.gmra.mxu2 %vm213_vm1, %v728_v6 }
  0xe1   : > { %1146 = vmatmul.msk.f32.vlgmr.msrb.gmra.mxu0 %vm213_vm1, %v728_v6 }
  0xe4   : > { %v834_v13 = vpop.permute.xlu1 %833  ;;  %v912_v18 = vpop.permute.xlu2 %911 }
  0xe5   : > { %v837_v14 = vsel %vm835_vm8, %v832_v11, %v834_v13  ;;  %v830_v15 = vpop.permute.xlu0 %829  ;;  %1151 = vmatpush.msk.msrb.mxu3 %vm216_vm0, %v834_v13 }
  0xe6   : > { %v836_v16 = vsel %vm835_vm8, %v830_v15, %v832_v11  ;;  %1149 = vmatpush.msk.msrb.mxu2 %vm216_vm0, %v837_v14  ;;  %1152 = vmatmul.msk.f32.vlgmr.msrb.gmra.mxu3 %vm213_vm1, %v820_v12 }
  0xe7   : > { %1147 = vmatpush.msk.msrb.mxu1 %vm216_vm0, %v836_v16  ;;  %1150 = vmatmul.msk.f32.vlgmr.msrb.gmra.mxu2 %vm213_vm1, %v820_v12 }
  0xe8   : > { %1148 = vmatmul.msk.f32.vlgmr.msrb.gmra.mxu1 %vm213_vm1, %v820_v12 }
  0xec   : > { %v926_v17 = vpop.permute.xlu1 %925 }
  0xed   : > { %1157 = vmatpush.msk.msra.mxu2 %vm216_vm0, %v926_v17  ;;  %v922_v19 = vpop.permute.xlu0 %921 }
  0xef   : > { %1158 = vmatmul.msk.f32.vlgmr.msra.gmra.mxu2 %vm213_vm1, %v912_v18 }
  0xf4   : > { %v924_v20 = vpop.permute.xlu1 %923 }
  0xf5   : > { %v929_v21 = vsel %vm927_vm9, %v924_v20, %v926_v17  ;;  %v928_v22 = vsel %vm927_vm9, %v922_v19, %v924_v20 }
  0xf6   : > { %1153 = vmatpush.msk.msra.mxu0 %vm216_vm0, %v928_v22  ;;  %1155 = vmatpush.msk.msra.mxu1 %vm216_vm0, %v929_v21 }
  0xf7   : > { %1154 = vmatmul.msk.f32.vlgmr.msra.gmra.mxu0 %vm213_vm1, %v912_v18  ;;  %1156 = vmatmul.msk.f32.vlgmr.msra.gmra.mxu1 %vm213_vm1, %v912_v18 }
 0x10d   : > { %v1004_v3 = vpop.permute.xlu2 %1003 }
 0x12d   : > { %v240_v23 = vpop.f32.mrf.mxu0 }
 0x12e   : > { %v260_v25 = vpop.f32.mrf.mxu1  ;;  %v315_v41 = vadd.f32 %v314_v26, %v240_v23 }
 0x132   : > { %v280_v24 = vpop.f32.mrf.mxu2 }
 0x135   : > { %v334_v27 = vpop.f32.mrf.mxu0 }
 0x136   : > { %v354_v29 = vpop.f32.mrf.mxu1  ;;  %v335_v44 = vadd.f32 %v334_v27, %v260_v25 }
 0x137   : > { %v355_v42 = vadd.f32 %v354_v29, %v280_v24 }
 0x13a   : > { %v403_v28 = vpop.f32.mrf.mxu2 }
 0x13b   : > { %v446_v45 = vadd.f32 %v403_v28, %v315_v41 }
 0x13d   : > { %v443_v31 = vpop.f32.mrf.mxu0 }
 0x13e   : > { %v495_v33 = vpop.f32.mrf.mxu1  ;;  %v448_v46 = vadd.f32 %v443_v31, %v355_v42 }
 0x13f   : > { %v538_v50 = vadd.f32 %v495_v33, %v446_v45 }
 0x142   : > { %v423_v30 = vpop.f32.mrf.mxu3 }
 0x143   : > { %v515_v32 = vpop.f32.mrf.mxu2  ;;  %v447_v48 = vadd.f32 %v423_v30, %v335_v44 }
 0x145   : > { %v539_v52 = vadd.f32 %v515_v32, %v447_v48 }
 0x14a   : > { %v535_v34 = vpop.f32.mrf.mxu3 }
 0x14b   : > { %v627_v36 = vpop.f32.mrf.mxu2  ;;  %v540_v49 = vadd.f32 %v535_v34, %v448_v46 }
 0x14d   : > { %v587_v35 = vpop.f32.mrf.mxu0  ;;  %v607_v37 = vpop.f32.mrf.mxu1  ;;  %v632_v53 = vadd.f32 %v627_v36, %v540_v49 }
 0x14e   : > { %v630_v54 = vadd.f32 %v587_v35, %v538_v50  ;;  %v631_v57 = vadd.f32 %v607_v37, %v539_v52 }
 0x154   : > { %v679_v38 = vpop.f32.mrf.mxu3 }
 0x155   : > { %v719_v43 = vpop.f32.mrf.mxu1  ;;  %v722_v58 = vadd.f32 %v679_v38, %v630_v54 }
 0x156   : > { %v699_v39 = vpop.f32.mrf.mxu0  ;;  %v724_v59 = vadd.f32 %v719_v43, %v632_v53 }
 0x157   : > { %v723_v61 = vadd.f32 %v699_v39, %v631_v57 }
 0x15c   : > { %v791_v47 = vpop.f32.mrf.mxu3 }
 0x15d   : > { %v815_v0 = vadd.f32 %v791_v47, %v723_v61 }
 0x15e   : > { %v811_v55 = vpop.f32.mrf.mxu0 }
 0x15f   : > { %v816_v62 = vadd.f32 %v811_v55, %v724_v59 }
 0x162   : > { %v771_v40 = vpop.f32.mrf.mxu2 }
 0x163   : > { %v814_v63 = vadd.f32 %v771_v40, %v722_v58 }
 0x165   : > { %v863_v56 = vpop.f32.mrf.mxu1 }
 0x166   : > { %v906_v4 = vadd.f32 %v863_v56, %v814_v63 }
 0x169   : > { %v903_v60 = vpop.f32.mrf.mxu3 }
 0x16a   : > { %v883_v51 = vpop.f32.mrf.mxu2  ;;  %v908_v1 = vadd.f32 %v903_v60, %v816_v62 }
 0x16b   : > { %v907_v5 = vadd.f32 %v883_v51, %v815_v0 }
 0x172   : > { %v995_v2 = vpop.f32.mrf.mxu2 }
 0x173   : > { %v1000_v6 = vadd.f32 %v995_v2, %v908_v1 }
 0x174   : > { %v955_v7 = vpop.f32.mrf.mxu0  ;;  %v975_v8 = vpop.f32.mrf.mxu1 }
 0x175   : > { %v1008_v9 = vadd.f32 %v1004_v3, %v1000_v6  ;;  %v998_v10 = vadd.f32 %v955_v7, %v906_v4  ;;  %v999_v11 = vadd.f32 %v975_v8, %v907_v5 }
 0x177   : > { %1012 = vst.msk [vmem:[%s188_s16 + $0x10] sm:$0xff] %vm1011_vm10, %v1008_v9  ;;  %v1006_v12 = vadd.f32 %v1004_v3, %v998_v10  ;;  %v1007_v13 = vadd.f32 %v1004_v3, %v999_v11 }
 0x179   : > { %1009 = vst [vmem:[%s188_s16] sm:$0xff] %v1006_v12 }
 0x17a   : > { %1010 = vst [vmem:[%s188_s16 + $0x8] sm:$0xff] %v1007_v13 }
 0x17b   : > { %1288 = shalt.err (!%p1285_p7)
}
 0x17c   : > { %1169 = dma.vmem_to_hbm [thread:$0]  (%p1411_p11), %s1028_s9, 384, %s1030_s10, %s1014_s11  }
 0x17d PF: > { %s1041_s25 = sand.u32 1, %s1315_s12   ;;  %p1176_p8 = pnand %p1102_p9, %p1415_p12 }
 0x17e   : > { %s1042_s30 = scalar_lea.sflag [#allocation4], %s1041_s25 }
 0x17f   : > { %p1177_p10 = pneg %p1176_p8 }
 0x181   : > { %1310 = dma.done.wait (%p1177_p10), %s1042_s30, 384  }
 0x182   : > { %1312 = vsyncadd (%p1177_p10), %s1042_s30, 4294966912  ;;  %p16_p0 = scmp.ge.s32.totalorder %s1390_s18, 4   ;;  %s1605_s12 = smov %s1319_s13 }
 0x183   : > { %s1606_s13 = smov %s1323_s14  ;;  %s1607_s14 = smov %s1402_s21 }
 0x184   : > { %s1608_s15 = smov %s1390_s18  ;;  %18 = sbr.rel (!%p16_p0) target bundleno = 5 (0x5), region = 86 }
 0x189   :  { %1048 = vsyncpa [#allocation3], 1 }
 0x18a   :  { %1050 = vsyncpa [#allocation3 + $0x1], 1 }
 0x18b   :  { %1051 = vsyncpa [#allocation4], 1 }
 0x18c   :  { %1053 = vsyncpa [#allocation4 + $0x1], 1 }

</bundles_post_ra>
